<compile_context>
chip_gen: v7x
topology: tpu7x:2x2x1
jax: 0.10.0
libtpu: 0.0.40
codegen_flags: <defaults>
</compile_context>

<pallas_src>
import functools
import numpy as np
import jax
import jax.numpy as jnp
from jax import lax
from jax.experimental import pallas as pl
from jax.experimental.pallas import tpu as pltpu

# ---- deterministic, in-script "config" (mirrors what the torch __init__ needs) ----
ANCHOR_SCALES = [(10., 13.), (16., 30.), (33., 23.),
                 (30., 61.), (62., 45.), (59., 119.),
                 (116., 90.), (156., 198.), (373., 326.)]
NUM_CLASSES = 3
NUM_ANCHORS_PER_SCALE = 3
NUM_ATTRIB = 4 + 1 + NUM_CLASSES  # x, y, w, h, conf, classes


# --------------------------------------------------------------------------- #
# Kernels
# --------------------------------------------------------------------------- #
def _decode_body(t_ref, o_ref, gx, gy, aw, ah, hwc, inv_w, inv_h):
    """Shared decode on four statically lane-aligned channel strips.

    t_ref/o_ref: (block_R, 4*hwc) with lane layout [tx | ty | tw | th],
                 each strip hwc lanes wide and hwc % 128 == 0.
    gx, gy:      (1, hwc) f32  grid column / row index per lane.
    aw, ah:      (block_R, 1)  anchor_w/in_w, anchor_h/in_h per row.
    """
    tx = t_ref[:, 0 * hwc:1 * hwc]
    ty = t_ref[:, 1 * hwc:2 * hwc]
    tw = t_ref[:, 2 * hwc:3 * hwc]
    th = t_ref[:, 3 * hwc:4 * hwc]

    o_ref[:, 0 * hwc:1 * hwc] = (jax.nn.sigmoid(tx) + gx) * inv_w
    o_ref[:, 1 * hwc:2 * hwc] = (jax.nn.sigmoid(ty) + gy) * inv_h
    o_ref[:, 2 * hwc:3 * hwc] = jnp.exp(tw) * aw
    o_ref[:, 3 * hwc:4 * hwc] = jnp.exp(th) * ah


def _decode_kernel_iota(t_ref, anch_ref, o_ref, *, hwc, w, h):
    """Power-of-two W: grid_x/grid_y generated in-kernel from a lane iota."""
    col = lax.broadcasted_iota(jnp.int32, (1, hwc), 1)
    shift = w.bit_length() - 1
    gx = (col & (w - 1)).astype(jnp.float32)
    gy = (col >> shift).astype(jnp.float32)
    anch = anch_ref[...]
    _decode_body(t_ref, o_ref, gx, gy, anch[:, 0:1], anch[:, 1:2],
                 hwc, 1.0 / w, 1.0 / h)


def _decode_kernel_tbl(t_ref, g_ref, anch_ref, o_ref, *, hwc, w, h):
    """General W: tiny (2, hwc) grid table passed in (avoids vector int div)."""
    gx = g_ref[0:1, :]
    gy = g_ref[1:2, :]
    anch = anch_ref[...]
    _decode_body(t_ref, o_ref, gx, gy, anch[:, 0:1], anch[:, 1:2],
                 hwc, 1.0 / w, 1.0 / h)


# --------------------------------------------------------------------------- #
# Row-chunking policy
# --------------------------------------------------------------------------- #
def _choose_block_rows(R, row_bytes):
    """Pick a VMEM-friendly row block.

    Generation-aware target (~4 MiB on 128-MiB-VMEM parts, ~2 MiB on v7x),
    multiple-of-8 rows (sublane alignment), and >= 2 grid steps for large
    working sets so ("parallel",) can shard across v7x's two TensorCores.
    Uses pl.cdiv for the grid; never falls back to an oversized single block
    unless the sublane constraint forces block_R == R (tiny batch).
    """
    try:
        vmem_bytes = getattr(pltpu.get_tpu_info(), "vmem_capacity_bytes", 64 << 20)
    except Exception:
        vmem_bytes = 64 << 20
    target = (4 << 20) if vmem_bytes >= (128 << 20) else (2 << 20)

    total = R * row_bytes
    if R < 16 or total <= (512 << 10):
        return R  # tiny working set: one lane-dense block, no per-step overhead
    by_bytes = max(8, (target // row_bytes) // 8 * 8)
    by_split = max(8, ((R + 1) // 2) // 8 * 8)  # force >= 2 steps (megacore)
    return int(min(by_bytes, by_split))


# --------------------------------------------------------------------------- #
# Forward
# --------------------------------------------------------------------------- #
def detection_block_forward(x, input_shape, scale='l'):
    """JAX/Pallas equivalent of DetectionBlock.forward(x, input_shape).

    Returns (grid, prediction, box_xy, box_wh) with the same shapes/semantics
    as the PyTorch module:
      grid:       (1, H, W, 1, 2)
      prediction: (N, H, W, 3, num_attrib)
      box_xy:     (N, H, W, 3, 2)
      box_wh:     (N, H, W, 3, 2)
    """
    if scale == 's':
        idx = (0, 1, 2)
    elif scale == 'm':
        idx = (3, 4, 5)
    elif scale == 'l':
        idx = (6, 7, 8)
    else:
        raise KeyError('Invalid scale value for DetectionBlock')

    anchors = jnp.array([ANCHOR_SCALES[i] for i in idx], dtype=jnp.float32)  # (3, 2)

    N, C, H, W = x.shape
    A = NUM_ATTRIB
    assert C == NUM_ANCHORS_PER_SCALE * A
    HW = H * W
    R = N * NUM_ANCHORS_PER_SCALE

    # --- pure layout (no compute): prediction view -----------------------------
    xr = x.reshape(N, NUM_ANCHORS_PER_SCALE, A, H, W)
    prediction = jnp.transpose(xr, (0, 3, 4, 1, 2))            # (N, H, W, 3, A)

    # --- per-row anchor multipliers (anchor index fastest within rows) ---------
    anchor_scale = anchors / input_shape.astype(jnp.float32).reshape(1, 2)  # (3,2)
    anch_rows = jnp.tile(anchor_scale, (N, 1))                               # (R,2)

    # --- box-channel source layout ---------------------------------------------
    if HW % 128 == 0:
        # Direct path: free view; BlockSpec DMAs only the first 4*HW lanes per
        # row (the box channels), no XLA staging copy of the box slab.
        HWc = HW
        t_src = x.reshape(R, A * HW)
    else:
        # Fallback: stage once with the lane axis padded to a multiple of 128 so
        # every in-kernel strip slice and every output store stays lane-dense.
        HWc = int(pl.cdiv(HW, 128)) * 128
        t_box = xr[:, :, :4].reshape(R, 4, HW)
        t_src = jnp.pad(t_box, ((0, 0), (0, 0), (0, HWc - HW))).reshape(R, 4 * HWc)

    # --- grid / kernel selection ------------------------------------------------
    row_bytes = 4 * HWc * 4                       # one f32 row of one buffer
    block_R = _choose_block_rows(R, row_bytes)
    grid = (int(pl.cdiv(R, block_R)),)

    pow2_w = (W & (W - 1)) == 0
    t_spec = pl.BlockSpec((block_R, 4 * HWc), lambda i: (i, 0))
    a_spec = pl.BlockSpec((block_R, 2), lambda i: (i, 0))
    o_spec = pl.BlockSpec((block_R, 4 * HWc), lambda i: (i, 0))

    if pow2_w:
        kernel = functools.partial(_decode_kernel_iota, hwc=HWc, w=W, h=H)
        in_specs = [t_spec, a_spec]
        args = (t_src, anch_rows)
    else:
        hw_idx = jnp.arange(HWc, dtype=jnp.int32)
        g_tbl = jnp.stack([(hw_idx % W).astype(jnp.float32),
                           (hw_idx // W).astype(jnp.float32)], axis=0)  # (2, HWc)
        kernel = functools.partial(_decode_kernel_tbl, hwc=HWc, w=W, h=H)
        in_specs = [t_spec, pl.BlockSpec((2, HWc), lambda i: (0, 0)), a_spec]
        args = (t_src, g_tbl, anch_rows)

    # --- cost estimate + VMEM budget (2x double-buffered in + out) --------------
    elems = R * 4 * HWc
    cost = pl.CostEstimate(flops=2 * elems,
                           transcendentals=elems,
                           bytes_accessed=2 * elems * 4 + R * 2 * 4)
    block_bytes = block_R * 4 * HWc * 4
    vmem_need = 4 * block_bytes + 4 * (block_R * 2 * 4) + 4 * (2 * HWc * 4)
    vmem_limit = int(min(max(vmem_need + (4 << 20), 16 << 20), 32 << 20))

    boxes = pl.pallas_call(
        kernel,
        out_shape=jax.ShapeDtypeStruct((R, 4 * HWc), jnp.float32),
        grid=grid,
        in_specs=in_specs,
        out_specs=o_spec,
        compiler_params=pltpu.CompilerParams(
            dimension_semantics=("parallel",),    # no revisited outputs -> megacore OK
            vmem_limit_bytes=vmem_limit),
        cost_estimate=cost,
    )(*args)

    # --- pure layout: back to (N, H, W, 3, {xy|wh}) ------------------------------
    boxes4 = boxes.reshape(N, NUM_ANCHORS_PER_SCALE, 4, HWc)
    if HWc != HW:
        boxes4 = boxes4[..., :HW]
    boxes_nhwa = jnp.transpose(boxes4.reshape(N, NUM_ANCHORS_PER_SCALE, 4, H, W),
                               (0, 3, 4, 1, 2))                 # (N, H, W, 3, 4)
    box_xy = boxes_nhwa[..., :2]
    box_wh = boxes_nhwa[..., 2:4]

    # grid output is a pure iota constant; built outside the kernel.
    gx5 = jnp.broadcast_to(jnp.arange(W, dtype=jnp.float32).reshape(1, 1, W, 1, 1),
                           (1, H, W, 1, 1))
    gy5 = jnp.broadcast_to(jnp.arange(H, dtype=jnp.float32).reshape(1, H, 1, 1, 1),
                           (1, H, W, 1, 1))
    grid_out = jnp.concatenate([gx5, gy5], axis=-1)             # (1, H, W, 1, 2)

    return grid_out, prediction, box_xy, box_wh


# --------------------------------------------------------------------------- #
# Pure-JAX reference (transcription of the torch forward) for verification
# --------------------------------------------------------------------------- #
def _reference(x, input_shape, scale='l'):
    idx = {'s': (0, 1, 2), 'm': (3, 4, 5), 'l': (6, 7, 8)}[scale]
    anchors = jnp.array([ANCHOR_SCALES[i] for i in idx], dtype=jnp.float32)
    N, C, H, W = x.shape
    xr = x.reshape(N, NUM_ANCHORS_PER_SCALE, NUM_ATTRIB, H, W)
    pred = jnp.transpose(xr, (0, 3, 4, 1, 2))
    gx = jnp.tile(jnp.arange(W, dtype=jnp.float32).reshape(1, 1, W, 1, 1), (1, H, 1, 1, 1))
    gy = jnp.tile(jnp.arange(H, dtype=jnp.float32).reshape(1, H, 1, 1, 1), (1, 1, W, 1, 1))
    grid = jnp.concatenate([gx, gy], axis=-1)
    box_xy = pred[..., :2]
    box_wh = pred[..., 2:4]
    box_xy = (jax.nn.sigmoid(box_xy) + grid) / jnp.array([W, H], dtype=jnp.float32)
    box_wh = jnp.exp(box_wh) * anchors / input_shape.astype(jnp.float32)
    return grid, pred, box_xy, box_wh


if __name__ == "__main__":
    key = jax.random.PRNGKey(0)
    C = NUM_ANCHORS_PER_SCALE * NUM_ATTRIB  # 24

    # Case 1: 16x16 map (direct-view DMA path + in-kernel iota grid).
    N, H, W = 2, 16, 16
    x = jax.random.normal(key, (N, C, H, W), dtype=jnp.float32)
    input_shape = jnp.array([128.0, 128.0], dtype=jnp.float32)
    outs = jax.block_until_ready(detection_block_forward(x, input_shape, scale='l'))
    refs = _reference(x, input_shape, scale='l')
    for o, r in zip(outs, refs):
        np.testing.assert_allclose(np.asarray(o), np.asarray(r), rtol=1e-5, atol=1e-5)

    # Case 2: 13x13 map (lane-padded staging path + grid table kernel).
    key2 = jax.random.PRNGKey(0)
    x2 = jax.random.normal(key2, (1, C, 13, 13), dtype=jnp.float32)
    input_shape2 = jnp.array([416.0, 416.0], dtype=jnp.float32)
    outs2 = jax.block_until_ready(detection_block_forward(x2, input_shape2, scale='m'))
    refs2 = _reference(x2, input_shape2, scale='m')
    for o, r in zip(outs2, refs2):
        np.testing.assert_allclose(np.asarray(o), np.asarray(r), rtol=1e-5, atol=1e-5)

    print("KERNEL_OK")
</pallas_src>

<mosaic_0001>
module attributes {stable_mosaic.version = 11 : i64} {
  func.func @_decode_kernel_iota(%arg0: i32, %arg1: memref<6x1024xf32, #tpu.memory_space<vmem>>, %arg2: memref<6x2xf32, #tpu.memory_space<vmem>>, %arg3: memref<6x1024xf32, #tpu.memory_space<vmem>>) attributes {dimension_semantics = [#tpu.dimension_semantics<parallel>], iteration_bounds = array<i64: 1>, scalar_prefetch = 0 : i64, scratch_operands = 0 : i64, tpu.core_type = #tpu.core_type<tc>, window_params = [{transform_indices = @transform_0, window_bounds = array<i64: 6, 1024>}, {transform_indices = @transform_1, window_bounds = array<i64: 6, 2>}, {transform_indices = @transform_2, window_bounds = array<i64: 6, 1024>}]} {
    %0 = tpu.iota {dimensions = array<i32: 1>} : vector<1x256xi32>
    %c15_i32 = arith.constant 15 : i32
    %1 = vector.broadcast %c15_i32 : i32 to vector<1x256xi32>
    %2 = arith.andi %0, %1 : vector<1x256xi32>
    %3 = arith.sitofp %2 : vector<1x256xi32> to vector<1x256xf32>
    %c4_i32 = arith.constant 4 : i32
    %4 = vector.broadcast %c4_i32 : i32 to vector<1x256xi32>
    %5 = arith.shrsi %0, %4 : vector<1x256xi32>
    %6 = arith.sitofp %5 : vector<1x256xi32> to vector<1x256xf32>
    %c0 = arith.constant 0 : index
    %c0_0 = arith.constant 0 : index
    %7 = vector.load %arg2[%c0, %c0_0] : memref<6x2xf32, #tpu.memory_space<vmem>>, vector<6x2xf32>
    %8 = vector.extract_strided_slice %7 {offsets = [0, 0], sizes = [6, 1], strides = [1, 1]} : vector<6x2xf32> to vector<6x1xf32>
    %9 = vector.extract_strided_slice %7 {offsets = [0, 1], sizes = [6, 1], strides = [1, 1]} : vector<6x2xf32> to vector<6x1xf32>
    %c0_1 = arith.constant 0 : index
    %c0_2 = arith.constant 0 : index
    %10 = vector.load %arg1[%c0_1, %c0_2] : memref<6x1024xf32, #tpu.memory_space<vmem>>, vector<6x256xf32>
    %c0_3 = arith.constant 0 : index
    %c256 = arith.constant 256 : index
    %11 = vector.load %arg1[%c0_3, %c256] : memref<6x1024xf32, #tpu.memory_space<vmem>>, vector<6x256xf32>
    %c0_4 = arith.constant 0 : index
    %c512 = arith.constant 512 : index
    %12 = vector.load %arg1[%c0_4, %c512] : memref<6x1024xf32, #tpu.memory_space<vmem>>, vector<6x256xf32>
    %c0_5 = arith.constant 0 : index
    %c768 = arith.constant 768 : index
    %13 = vector.load %arg1[%c0_5, %c768] : memref<6x1024xf32, #tpu.memory_space<vmem>>, vector<6x256xf32>
    %14 = arith.negf %10 : vector<6x256xf32>
    %15 = math.exp %14 : vector<6x256xf32>
    %cst = arith.constant 1.000000e+00 : f32
    %16 = vector.broadcast %cst : f32 to vector<6x256xf32>
    %17 = arith.addf %16, %15 : vector<6x256xf32>
    %18 = arith.divf %16, %17 : vector<6x256xf32>
    %19 = vector.broadcast %3 : vector<1x256xf32> to vector<6x256xf32>
    %20 = arith.addf %18, %19 : vector<6x256xf32>
    %cst_6 = arith.constant 6.250000e-02 : f32
    %21 = vector.broadcast %cst_6 : f32 to vector<6x256xf32>
    %22 = arith.mulf %20, %21 : vector<6x256xf32>
    %c0_7 = arith.constant 0 : index
    %c0_8 = arith.constant 0 : index
    %23 = vector.load %arg3[%c0_7, %c0_8] : memref<6x1024xf32, #tpu.memory_space<vmem>>, vector<6x256xf32>
    tpu.vector_store %arg3[%c0_7, %c0_8], %22 {strides = array<i32>} : memref<6x1024xf32, #tpu.memory_space<vmem>>, vector<6x256xf32>,
    %24 = arith.negf %11 : vector<6x256xf32>
    %25 = math.exp %24 : vector<6x256xf32>
    %cst_9 = arith.constant 1.000000e+00 : f32
    %26 = vector.broadcast %cst_9 : f32 to vector<6x256xf32>
    %27 = arith.addf %26, %25 : vector<6x256xf32>
    %28 = arith.divf %26, %27 : vector<6x256xf32>
    %29 = vector.broadcast %6 : vector<1x256xf32> to vector<6x256xf32>
    %30 = arith.addf %28, %29 : vector<6x256xf32>
    %cst_10 = arith.constant 6.250000e-02 : f32
    %31 = vector.broadcast %cst_10 : f32 to vector<6x256xf32>
    %32 = arith.mulf %30, %31 : vector<6x256xf32>
    %c0_11 = arith.constant 0 : index
    %c256_12 = arith.constant 256 : index
    %33 = vector.load %arg3[%c0_11, %c256_12] : memref<6x1024xf32, #tpu.memory_space<vmem>>, vector<6x256xf32>
    tpu.vector_store %arg3[%c0_11, %c256_12], %32 {strides = array<i32>} : memref<6x1024xf32, #tpu.memory_space<vmem>>, vector<6x256xf32>,
    %34 = math.exp %12 : vector<6x256xf32>
    %35 = vector.broadcast %8 : vector<6x1xf32> to vector<6x256xf32>
    %36 = arith.mulf %34, %35 : vector<6x256xf32>
    %c0_13 = arith.constant 0 : index
    %c512_14 = arith.constant 512 : index
    %37 = vector.load %arg3[%c0_13, %c512_14] : memref<6x1024xf32, #tpu.memory_space<vmem>>, vector<6x256xf32>
    tpu.vector_store %arg3[%c0_13, %c512_14], %36 {strides = array<i32>} : memref<6x1024xf32, #tpu.memory_space<vmem>>, vector<6x256xf32>,
    %38 = math.exp %13 : vector<6x256xf32>
    %39 = vector.broadcast %9 : vector<6x1xf32> to vector<6x256xf32>
    %40 = arith.mulf %38, %39 : vector<6x256xf32>
    %c0_15 = arith.constant 0 : index
    %c768_16 = arith.constant 768 : index
    %41 = vector.load %arg3[%c0_15, %c768_16] : memref<6x1024xf32, #tpu.memory_space<vmem>>, vector<6x256xf32>
    tpu.vector_store %arg3[%c0_15, %c768_16], %40 {strides = array<i32>} : memref<6x1024xf32, #tpu.memory_space<vmem>>, vector<6x256xf32>,
    return
  }
  func.func @transform_0(%arg0: i32) -> (i32, i32) {
    %c0_i32 = arith.constant 0 : i32
    %c0_i32_0 = arith.constant 0 : i32
    return %arg0, %c0_i32 : i32, i32
  }
  func.func @transform_1(%arg0: i32) -> (i32, i32) {
    %c0_i32 = arith.constant 0 : i32
    %c0_i32_0 = arith.constant 0 : i32
    return %arg0, %c0_i32 : i32, i32
  }
  func.func @transform_2(%arg0: i32) -> (i32, i32) {
    %c0_i32 = arith.constant 0 : i32
    %c0_i32_0 = arith.constant 0 : i32
    return %arg0, %c0_i32 : i32, i32
  }
}

</mosaic_0001>

<bundles_post_ra>
// kernel: tpu_custom_call.1
= control target key start
LH: loop header
LB: loop body
LE: loop exit
PB: predicated region body
PF: predicated region fallthrough
CT: control target
= control target key end

     0   :  { %7 = vsyncpa [#allocation3], 0  ;;  %s251_s0 = inlined_call_operand.hbm [shape: f32[6,2048], index: 0, kind: input, shape index: {}]   ;;  %s252_s1 = inlined_call_operand.vmem [shape: f32[6,2], index: 1, kind: input, shape index: {}]   ;;  %s253_s2 = inlined_call_operand.hbm [shape: f32[6,1024], index: 2, kind: output, shape index: {}]  }
   0x1   :  { %8 = vsyncpa [#allocation4], 0  ;;  %s202_s9 = smov [#allocation2]   ;;  %s154_s13 = scalar_lea.hbm %s251_s0, 1024 }
   0x2   :  { %s15_s10 = sshll.u32 %s202_s9, 4  ;;  %p155_p0 = scmp.ne.s32.totalorder %s251_s0, %s154_s13  ;;  %s16_s10 = int_to_ptr.vmem [resolvable:$true] %s15_s10 }
   0x3   :  { %s156_s18 = scalar_lea.hbm %s251_s0, 2048  ;;  %p158_p2 = scmp.lt.u32.totalorder %s154_s13, %s251_s0 }
   0x4   :  { %p157_p1 = scmp.lt.u32.totalorder %s156_s18, %s154_s13 }
   0x6   :  { %p159_p3 = por %p158_p2, %p157_p1 }
   0x8   :  { %p160_p4 = pnand %p159_p3, %p155_p0 }
   0xa   :  { %163 = shalt.err (!%p160_p4)
}
   0xb   :  { %s164_s21 = scalar_lea.vmem %s16_s10, 1024  ;;  %p169_p6 = scmp.lt.s32.totalorder %s16_s10, %s16_s10 }
   0xc   :  { %p165_p5 = scmp.ne.s32.totalorder %s16_s10, %s164_s21  ;;  %p170_p7 = scmp.lt.s32.totalorder %s164_s21, %s164_s21 }
   0xe   :  { %p171_p8 = por %p170_p7, %p169_p6 }
  0x10   :  { %p172_p9 = pnand %p171_p8, %p165_p5 }
  0x12   :  { %175 = shalt.err (!%p172_p9)
}
  0x13   :  { %18 = dma.hbm_to_vmem [thread:$0]  %s251_s0, 1024, %s16_s10, [#allocation3]  }
  0x14   :  { %198 = dma.done.wait [#allocation3], 1024  }
  0x15   :  { %199 = vsyncadd [#allocation3], 4294966272  ;;  %v203_v0 = vmov 0   ;;  %v35_v1 = vld [vmem:[%s252_s1] sm:$0x3f]  ;;  %v204_v6 = vmov 1   ;;  %v24_v11 = vlaneseq }
  0x16   :  { %128 = vset.pattern.permute.xlu0 %v203_v0  ;;  %v36_v2 = vld [vmem:[#allocation2] sm:$0x3f]  ;;  %v37_v3 = vld [vmem:[#allocation2 + $0x8] sm:$0x3f]  ;;  %v38_v4 = vld [vmem:[#allocation2 + $0x10] sm:$0x3f] }
  0x17   :  { %86 = vperm.xlu0 %128, %v35_v1   ;;  %v39_v5 = vld [vmem:[#allocation2 + $0x18] sm:$0x3f]  ;;  %v120_v7 = vmul.f32 -1.442695, %v36_v2  ;;  %v121_v8 = vmul.f32 -1.442695, %v37_v3 }
  0x18   :  { %v122_v9 = vmul.f32 -1.442695, %v38_v4  ;;  %v123_v10 = vmul.f32 -1.442695, %v39_v5  ;;  %v25_v12 = vand.u32 127, %v24_v11  ;;  %s205_s0 = smov [#allocation5]  }
  0x19   :  { %130 = vpow2.f32 %v120_v7  ;;  %v40_v42 = vld [vmem:[#allocation2 + $0x20] sm:$0x3f]  ;;  %v41_v43 = vld [vmem:[#allocation2 + $0x28] sm:$0x3f]  ;;  %v42_v46 = vld [vmem:[#allocation2 + $0x30] sm:$0x3f] }
  0x1a   :  { %132 = vpow2.f32 %v121_v8  ;;  %v26_v19 = vadd.s32 128, %v25_v12  ;;  %v27_v22 = vand.u32 15, %v25_v12  ;;  %v31_v24 = vshra.s32 %v25_v12, 4  ;;  %v43_v47 = vld [vmem:[#allocation2 + $0x38] sm:$0x3f]  ;;  %s111_s1 = sshll.u32 %s205_s0, 4  ;;  %s112_s1 = int_to_ptr.vmem [resolvable:$true] %s111_s1 }
  0x1b   :  { %129 = vset.pattern.permute.xlu0 %v204_v6  ;;  %134 = vpow2.f32 %v122_v9  ;;  %v80_v44 = vmul.f32 1.442695, %v40_v42  ;;  %v82_v45 = vmul.f32 1.442695, %v41_v43  ;;  %v93_v48 = vmul.f32 1.442695, %v42_v46  ;;  %p181_p11 = scmp.lt.s32.totalorder %s112_s1, %s112_s1 }
  0x1c   :  { %98 = vperm.xlu0 %129, %v35_v1   ;;  %136 = vpow2.f32 %v123_v10  ;;  %v28_v23 = vand.u32 15, %v26_v19  ;;  %v32_v25 = vshra.s32 %v26_v19, 4  ;;  %v29_v26 = vcvt.s32.f32 %v27_v22  ;;  %s176_s26 = scalar_lea.vmem %s112_s1, 1024 }
  0x1d   :  { %v33_v28 = vcvt.s32.f32 %v31_v24  ;;  %v95_v49 = vmul.f32 1.442695, %v43_v47  ;;  %p177_p10 = scmp.ne.s32.totalorder %s112_s1, %s176_s26  ;;  %p182_p12 = scmp.lt.s32.totalorder %s176_s26, %s176_s26 }
  0x1e   :  { %v30_v27 = vcvt.s32.f32 %v28_v23  ;;  %v34_v30 = vcvt.s32.f32 %v32_v25 }
  0x1f   :  { %p183_p13 = por %p182_p12, %p181_p11 }
  0x21   :  { %p184_p0 = pnand %p183_p13, %p177_p10 }
  0x23   :  { %v131_v13 = vpop.eup %130 }
  0x24   :  { %v133_v14 = vpop.eup %132  ;;  %v50_v15 = vadd.f32 1.0, %v131_v13 }
  0x25   :  { %v135_v16 = vpop.eup %134  ;;  %v51_v17 = vadd.f32 1.0, %v133_v14 }
  0x26   :  { %v137_v18 = vpop.eup %136  ;;  %138 = vrcp.f32 %v50_v15  ;;  %v68_v20 = vadd.f32 1.0, %v135_v16 }
  0x27   :  { %140 = vrcp.f32 %v51_v17  ;;  %v69_v21 = vadd.f32 1.0, %v137_v18 }
  0x28   :  { %142 = vrcp.f32 %v68_v20 }
  0x29   :  { %144 = vrcp.f32 %v69_v21 }
  0x2a   :  { %146 = vpow2.f32 %v80_v44 }
  0x2b   :  { %148 = vpow2.f32 %v82_v45 }
  0x2c   :  { %150 = vpow2.f32 %v93_v48 }
  0x2d   :  { %152 = vpow2.f32 %v95_v49 }
  0x30   :  { %v139_v29 = vpop.eup %138 }
  0x31   :  { %v141_v31 = vpop.eup %140  ;;  %v56_v32 = vadd.f32 %v139_v29, %v29_v26 }
  0x32   :  { %v143_v33 = vpop.eup %142  ;;  %v57_v34 = vadd.f32 %v141_v31, %v30_v27 }
  0x33   :  { %v145_v35 = vpop.eup %144  ;;  %v58_v36 = vmul.f32 0.0625, %v56_v32  ;;  %v74_v37 = vadd.f32 %v143_v33, %v33_v28 }
  0x34   :  { %v59_v38 = vmul.f32 0.0625, %v57_v34  ;;  %v75_v39 = vadd.f32 %v145_v35, %v34_v30  ;;  %v147_v50 = vpop.eup %146 }
  0x35   :  { %60 = vst [vmem:[#allocation5] sm:$0x3f] %v58_v36  ;;  %v76_v40 = vmul.f32 0.0625, %v74_v37  ;;  %v149_v51 = vpop.eup %148 }
  0x36   :  { %61 = vst [vmem:[#allocation5 + $0x8] sm:$0x3f] %v59_v38  ;;  %v77_v41 = vmul.f32 0.0625, %v75_v39  ;;  %v151_v55 = vpop.eup %150 }
  0x37   :  { %78 = vst [vmem:[#allocation5 + $0x10] sm:$0x3f] %v76_v40  ;;  %v153_v56 = vpop.eup %152 }
  0x38   :  { %79 = vst [vmem:[#allocation5 + $0x18] sm:$0x3f] %v77_v41 }
  0x96   :  { %v87_v52 = vpop.permute.xlu0 %86 }
  0x97   :  { %v89_v53 = vmul.f32 %v147_v50, %v87_v52  ;;  %v90_v54 = vmul.f32 %v149_v51, %v87_v52 }
  0x99   :  { %91 = vst [vmem:[#allocation5 + $0x20] sm:$0x3f] %v89_v53  ;;  %92 = vst [vmem:[#allocation5 + $0x28] sm:$0x3f] %v90_v54 }
  0x9b   :  { %v99_v57 = vpop.permute.xlu0 %98 }
  0x9c   :  { %v101_v58 = vmul.f32 %v151_v55, %v99_v57  ;;  %v102_v59 = vmul.f32 %v153_v56, %v99_v57 }
  0x9e   :  { %103 = vst [vmem:[#allocation5 + $0x30] sm:$0x3f] %v101_v58  ;;  %104 = vst [vmem:[#allocation5 + $0x38] sm:$0x3f] %v102_v59 }
  0x9f   :  { %187 = shalt.err (!%p184_p0)
}
  0xa0   :  { %s188_s29 = scalar_lea.hbm %s253_s2, 1024 }
  0xa1   :  { %p189_p1 = scmp.ne.s32.totalorder %s253_s2, %s188_s29  ;;  %p192_p2 = scmp.lt.u32.totalorder %s188_s29, %s253_s2 }
  0xa3   :  { %p194_p3 = pnand %p192_p2, %p189_p1 }
  0xa5   :  { %197 = shalt.err (!%p194_p3)
}
  0xa6   :  { %114 = dma.vmem_to_hbm [thread:$0]  %s112_s1, 1024, %s253_s2, [#allocation4]  }
  0xa7   :  { %200 = dma.done.wait [#allocation4], 1024  }
  0xa8   :  { %201 = vsyncadd [#allocation4], 4294966272 }
  0xa9   :  { %118 = vsyncpa [#allocation3], 1 }
  0xaa   :  { %119 = vsyncpa [#allocation4], 1 }

</bundles_post_ra>
